<compile_context>
chip_gen: v6e
topology: v6e:2x2x1
jax: 0.10.0
libtpu: 0.0.40
codegen_flags: <defaults>
</compile_context>

<pallas_src>
import numpy as np
import jax
import jax.numpy as jnp
from jax.experimental import pallas as pl
from jax.experimental.pallas import tpu as pltpu


def _round_up(x, m):
    return ((x + m - 1) // m) * m


def _cparams(sem, est_bytes):
    # per-kernel VMEM limit from the actual block footprint (3x margin),
    # kept well under v7x's 64 MiB physical VMEM.
    vlim = int(min(max(3 * est_bytes, 8 * 1024 * 1024), 40 * 1024 * 1024))
    return pltpu.CompilerParams(dimension_semantics=sem, vmem_limit_bytes=vlim)


# ----------------------------------------------------------------------------
# Pallas kernels
# ----------------------------------------------------------------------------
def linear_pallas(x, w, b=None, relu=False, out_dtype=jnp.float32,
                  block_rows=8192):
    """y = x @ w + b (optional ReLU).  Row-tiled parallel grid, bf16 matmul
    inputs, f32 accumulation.  x:(N,Cin)  w:(Cin,Cout)  b:(Cout,) or None."""
    Nr, Cin = x.shape
    Cout = w.shape[1]
    if Nr >= block_rows:
        RB = block_rows
    else:
        RB = _round_up(max(Nr, 1), 16)      # bf16 sublane packing is 16
    Np = _round_up(Nr, RB)
    xp = x.astype(jnp.bfloat16)
    if Np != Nr:
        xp = jnp.pad(xp, ((0, Np - Nr), (0, 0)))
    wb = w.astype(jnp.bfloat16)
    bb = (jnp.zeros((1, Cout), jnp.float32) if b is None
          else b.reshape(1, Cout).astype(jnp.float32))

    def kernel(x_ref, w_ref, b_ref, o_ref):
        y = jnp.dot(x_ref[...], w_ref[...], preferred_element_type=jnp.float32)
        y = y + b_ref[...]
        if relu:
            y = jnp.maximum(y, 0.0)
        o_ref[...] = y.astype(o_ref.dtype)

    est = 2 * RB * Cin * 2 + Cin * Cout * 2 + Cout * 4 + 2 * RB * Cout * 4
    out = pl.pallas_call(
        kernel,
        out_shape=jax.ShapeDtypeStruct((Np, Cout), out_dtype),
        grid=(Np // RB,),
        in_specs=[
            pl.BlockSpec((RB, Cin), lambda i: (i, 0)),
            pl.BlockSpec((Cin, Cout), lambda i: (0, 0)),
            pl.BlockSpec((1, Cout), lambda i: (0, 0)),
        ],
        out_specs=pl.BlockSpec((RB, Cout), lambda i: (i, 0)),
        compiler_params=_cparams(("parallel",), est),
    )(xp, wb, bb)
    return out[:Nr]


def conv3d_gn_relu_pallas(x, w, gamma, beta, occ_w=None, num_groups=16,
                          eps=1e-5, block_cols=2048):
    """Fused 3x3x3 Conv3d (stride 1, pad 1, no bias) + GroupNorm + ReLU, with
    an optional fused 1x1x1 occ head (second output).

    x: (N, Cin, D1, D2, D3) channel-first.  w: (Cout, Cin, 3, 3, 3) torch
    layout.  occ_w: (num_classes, Cout) or None.

    Glue builds a (N, 27*Cin, R) K-packed im2col (spatial last -> lane dim);
    the kernel is a single (Cout, 27*Cin)x(27*Cin, RB) dot per grid step that
    accumulates into the resident (Cout, Rp) f32 output block.  The last step
    computes masked two-pass GroupNorm statistics on that block, normalizes,
    applies ReLU and (optionally) the occ head, and stores once, lane-dense."""
    N, Cin, D1, D2, D3 = x.shape
    Cout = w.shape[0]
    assert Cout % num_groups == 0
    cs = Cout // num_groups
    R = D1 * D2 * D3
    K27 = 27 * Cin
    Rp = _round_up(R, 128)
    RB = min(Rp, block_cols)
    Rp = _round_up(Rp, RB)
    nb = Rp // RB
    cnt = float(R * cs)

    # glue-side im2col (tiny volumes; see TODO at top for production sizes)
    xpad = jnp.pad(x.astype(jnp.bfloat16), ((0, 0), (0, 0), (1, 1), (1, 1), (1, 1)))
    taps = [xpad[:, :, kd:kd + D1, kh:kh + D2, kw:kw + D3]
            for kd in range(3) for kh in range(3) for kw in range(3)]
    patches = jnp.concatenate(taps, axis=1).reshape(N, K27, R)
    if Rp != R:
        patches = jnp.pad(patches, ((0, 0), (0, 0), (0, Rp - R)))

    w2 = jnp.transpose(w, (0, 2, 3, 4, 1)).reshape(Cout, K27).astype(jnp.bfloat16)
    g2 = gamma.reshape(Cout, 1).astype(jnp.float32)
    b2 = beta.reshape(Cout, 1).astype(jnp.float32)
    grp = np.arange(Cout) // cs
    gm = jnp.asarray((grp[:, None] == grp[None, :]).astype(np.float32))
    mask = jnp.asarray((np.arange(Rp) < R).astype(np.float32).reshape(1, Rp))

    has_occ = occ_w is not None
    if has_occ:
        ncls = occ_w.shape[0]
        nc8 = _round_up(ncls, 8)
        occ_wp = jnp.zeros((nc8, Cout), jnp.float32)
        occ_wp = occ_wp.at[:ncls].set(occ_w.astype(jnp.float32))

    def kernel(x_ref, w_ref, m_ref, g_ref, b_ref, gm_ref, *rest):
        if has_occ:
            occw_ref, o_ref, occ_ref = rest
        else:
            (o_ref,) = rest
        j = pl.program_id(1)
        col = pl.multiple_of(j * RB, RB)
        o_ref[:, pl.ds(col, RB)] = jnp.dot(
            w_ref[...], x_ref[...], preferred_element_type=jnp.float32)

        @pl.when(j == pl.num_programs(1) - 1)
        def _():
            msk = m_ref[...]                               # (1, Rp)

            def group_sum(a):                              # (Cout, Rp) -> (Cout, 1)
                if cs > 1:
                    a = jnp.dot(gm_ref[...], a, preferred_element_type=jnp.float32)
                return jnp.sum(a, axis=1, keepdims=True)

            s1 = group_sum(o_ref[...] * msk)
            mean = s1 * (1.0 / cnt)
            dcen = (o_ref[...] - mean) * msk
            s2 = group_sum(dcen * dcen)
            inv = jax.lax.rsqrt(s2 * (1.0 / cnt) + eps)
            o_ref[...] = jnp.maximum((o_ref[...] - mean) * inv * g_ref[...]
                                     + b_ref[...], 0.0)
            if has_occ:
                occ_ref[...] = jnp.dot(occw_ref[...], o_ref[...],
                                       preferred_element_type=jnp.float32)

    in_specs = [
        pl.BlockSpec((None, K27, RB), lambda n, j: (n, 0, j)),
        pl.BlockSpec((Cout, K27), lambda n, j: (0, 0)),
        pl.BlockSpec((1, Rp), lambda n, j: (0, 0)),
        pl.BlockSpec((Cout, 1), lambda n, j: (0, 0)),
        pl.BlockSpec((Cout, 1), lambda n, j: (0, 0)),
        pl.BlockSpec((Cout, Cout), lambda n, j: (0, 0)),
    ]
    args = [patches, w2, mask, g2, b2, gm]
    out_shapes = [jax.ShapeDtypeStruct((N, Cout, Rp), jnp.float32)]
    out_specs = [pl.BlockSpec((None, Cout, Rp), lambda n, j: (n, 0, 0))]
    est = (2 * K27 * RB * 2 + 2 * Cout * Rp * 4 + 2 * Rp * 4
           + K27 * Cout * 2 + Cout * Cout * 4 + 2 * Cout * 4)
    if has_occ:
        in_specs.append(pl.BlockSpec((nc8, Cout), lambda n, j: (0, 0)))
        args.append(occ_wp)
        out_shapes.append(jax.ShapeDtypeStruct((N, nc8, Rp), jnp.float32))
        out_specs.append(pl.BlockSpec((None, nc8, Rp), lambda n, j: (n, 0, 0)))
        est += 2 * nc8 * Rp * 4 + nc8 * Cout * 4

    res = pl.pallas_call(
        kernel,
        out_shape=out_shapes,
        grid=(N, nb),
        in_specs=in_specs,
        out_specs=out_specs,
        compiler_params=_cparams(("parallel", "arbitrary"), est),
    )(*args)

    y = res[0][:, :, :R].reshape(N, Cout, D1, D2, D3)
    if has_occ:
        occ = res[1][:, :ncls, :R].reshape(N, ncls, D1, D2, D3)
        return y, occ
    return y, None


def deconv3d_s2_gn_relu_pallas(x, w, gamma, beta, num_groups=16, eps=1e-5):
    """Fused ConvTranspose3d(kernel=2, stride=2, no bias) + GroupNorm + ReLU.
    kernel == stride => no overlap, so the op is one (8*Cout, Cin)x(Cin, R)
    matmul with a lane-dense (8*Cout, R) result; GN stats / normalize / ReLU
    run on the resident f32 output block before a single store.  The
    interleave to (2*D1, 2*D2, 2*D3) is an XLA reshape/transpose in glue.
    x: (N, Cin, D1, D2, D3);  w: torch layout (Cin, Cout, 2, 2, 2)."""
    N, Cin, D1, D2, D3 = x.shape
    Cout = w.shape[1]
    C8 = 8 * Cout
    assert Cout % num_groups == 0
    cs = Cout // num_groups
    R = D1 * D2 * D3
    Rp = _round_up(R, 128)
    cnt = float(R * 8 * cs)

    xf = x.reshape(N, Cin, R).astype(jnp.bfloat16)
    if Rp != R:
        xf = jnp.pad(xf, ((0, 0), (0, 0), (0, Rp - R)))
    # rows ordered (co, kd, kh, kw)
    w2 = jnp.transpose(w, (1, 2, 3, 4, 0)).reshape(C8, Cin).astype(jnp.bfloat16)
    g8 = jnp.repeat(gamma.astype(jnp.float32), 8).reshape(C8, 1)
    b8 = jnp.repeat(beta.astype(jnp.float32), 8).reshape(C8, 1)
    rgrp = (np.arange(C8) // 8) // cs
    gm = jnp.asarray((rgrp[:, None] == rgrp[None, :]).astype(np.float32))
    mask = jnp.asarray((np.arange(Rp) < R).astype(np.float32).reshape(1, Rp))

    def kernel(x_ref, w_ref, m_ref, g_ref, b_ref, gm_ref, o_ref):
        o_ref[...] = jnp.dot(w_ref[...], x_ref[...],
                             preferred_element_type=jnp.float32)
        msk = m_ref[...]

        def group_sum(a):                                  # (C8, Rp) -> (C8, 1)
            a = jnp.dot(gm_ref[...], a, preferred_element_type=jnp.float32)
            return jnp.sum(a, axis=1, keepdims=True)

        mean = group_sum(o_ref[...] * msk) * (1.0 / cnt)
        dcen = (o_ref[...] - mean) * msk
        var = group_sum(dcen * dcen) * (1.0 / cnt)
        y = (o_ref[...] - mean) * jax.lax.rsqrt(var + eps) * g_ref[...] + b_ref[...]
        o_ref[...] = jnp.maximum(y, 0.0)

    est = (2 * Cin * Rp * 2 + 2 * C8 * Rp * 4 + C8 * Cin * 2
           + C8 * C8 * 4 + 2 * Rp * 4 + 2 * C8 * 4)
    out = pl.pallas_call(
        kernel,
        out_shape=jax.ShapeDtypeStruct((N, C8, Rp), jnp.float32),
        grid=(N,),
        in_specs=[
            pl.BlockSpec((None, Cin, Rp), lambda n: (n, 0, 0)),
            pl.BlockSpec((C8, Cin), lambda n: (0, 0)),
            pl.BlockSpec((1, Rp), lambda n: (0, 0)),
            pl.BlockSpec((C8, 1), lambda n: (0, 0)),
            pl.BlockSpec((C8, 1), lambda n: (0, 0)),
            pl.BlockSpec((C8, C8), lambda n: (0, 0)),
        ],
        out_specs=pl.BlockSpec((None, C8, Rp), lambda n: (n, 0, 0)),
        compiler_params=_cparams(("parallel",), est),
    )(xf, w2, mask, g8, b8, gm)
    y = out[:, :, :R].reshape(N, Cout, 2, 2, 2, D1, D2, D3)
    y = jnp.transpose(y, (0, 1, 5, 2, 6, 3, 7, 4))
    return y.reshape(N, Cout, 2 * D1, 2 * D2, 2 * D3)


def occ_1x1_pallas(x, w_occ):
    """Fallback standalone 1x1x1 occ head (only used when not fused).
    x: (N, C, D1, D2, D3);  w_occ: (num_classes, C)."""
    N, C = x.shape[0], x.shape[1]
    sp = x.shape[2:]
    rows = jnp.transpose(x.reshape(N, C, -1), (0, 2, 1)).reshape(-1, C)
    pred = linear_pallas(rows, jnp.transpose(w_occ), None, relu=False)
    ncls = w_occ.shape[0]
    pred = jnp.transpose(pred.reshape(N, -1, ncls), (0, 2, 1))
    return pred.reshape((N, ncls) + sp)


# ----------------------------------------------------------------------------
# Dependent function (pure tensor math, plain JAX)
# ----------------------------------------------------------------------------
def get_discretized_transformation_matrix_3d(matrix, discrete_ratio, downsample_rate):
    """matrix: (B, L, 4, 4) -> (B, L, 3, 4) with translation discretized."""
    m = matrix[:, :, :3, :4]
    m = m.at[..., -1].set(m[..., -1] / (discrete_ratio * downsample_rate))
    return m.astype(jnp.float32)


# ----------------------------------------------------------------------------
# Model forward
# ----------------------------------------------------------------------------
def v2v_occ_head_forward(params, mlvl_feats, img_metas, cfg):
    bs, num_cam = mlvl_feats[0].shape[:2]
    car_num = num_cam // 4
    fpn_level = len(cfg["embed_dims"])
    out_indices = cfg["out_indices"]

    # ---- per-level transfer conv (batched over ALL cameras) + (stub) transformer
    volume_embed = []
    for i in range(fpn_level):
        E = cfg["embed_dims"][i]
        feat = mlvl_feats[i]                                   # (bs, num_cam, C, H, W)
        _, _, C, H, W = feat.shape
        vq = params["volume_embedding"][i]                     # (Nq, E)

        xrows = jnp.transpose(feat.reshape(bs * num_cam, C, H, W),
                              (0, 2, 3, 1)).reshape(bs * num_cam * H * W, C)
        y = linear_pallas(xrows, params["transfer_w"][i], params["transfer_b"][i],
                          relu=True)
        view = y.reshape(bs, car_num, 4, H, W, E)

        # TODO(synk): deformable-attention volume transformer replaced by stub.
        pooled = jnp.mean(view, axis=(2, 3, 4))                # (bs, car, E)
        proj = linear_pallas(pooled.reshape(bs * car_num, E),
                             params["trans_proj_w"][i], None).reshape(bs, car_num, E)
        per_car = [vq[None, :, :] + proj[:, j, :][:, None, :] for j in range(car_num)]
        volume_embed.append(jnp.concatenate(per_car, axis=0))  # (bs*car_num, Nq, E)

    # ---- reshape volumes: torch (N,Z,H,W,C).permute(0,4,3,2,1) -> channel-first (N,C,W,H,Z)
    volume_embed_reshape = []
    for i in range(fpn_level):
        vh, vw, vz = cfg["volume_h"][i], cfg["volume_w"][i], cfg["volume_z"][i]
        v = volume_embed[i].reshape(bs * car_num, vz, vh, vw, cfg["embed_dims"][i])
        volume_embed_reshape.append(jnp.transpose(v, (0, 4, 3, 2, 1)))

    # ---- deblocks (fused conv/deconv + GN + ReLU kernels, occ heads fused) ----
    outputs = []
    occ_for_output = []
    result = volume_embed_reshape.pop()
    for i, stride in enumerate(cfg["upsample_strides"]):
        fused_occ = None
        if stride > 1:
            result = deconv3d_s2_gn_relu_pallas(
                result, params["deblock_w"][i],
                params["deblock_gn_g"][i], params["deblock_gn_b"][i])
        else:
            want_occ = (i in out_indices) and (i != out_indices[-1])
            occ_w = params["occ_w"][out_indices.index(i)] if want_occ else None
            result, fused_occ = conv3d_gn_relu_pallas(
                result, params["deblock_w"][i],
                params["deblock_gn_g"][i], params["deblock_gn_b"][i],
                occ_w=occ_w)
        if i in out_indices:
            outputs.append(result)
            occ_for_output.append(fused_occ)
        elif i in (1, 3) and len(volume_embed_reshape) > 0:
            result = result + volume_embed_reshape.pop()       # f32 residual add

    # ---- v2v fusion ----
    features = outputs.pop()                                   # (bs*car_num, C, H, W, Z)
    occ_for_output.pop()
    _, C, H, W, Z = features.shape
    features = features.reshape(bs, car_num, C, H, W, Z)

    voxel_size = 0.1 * 48 / Z
    btm = jnp.asarray(
        np.stack([[np.asarray(m["trans2ego"][c], np.float32) for c in range(car_num)]
                  for m in img_metas]), jnp.float32)
    btm = get_discretized_transformation_matrix_3d(btm, voxel_size, 1)

    fuse_inputs = []
    for b in range(bs):
        ego_feature = features[b, 0][None]                     # (1, C, H, W, Z)
        fuse_feats = [ego_feature]
        for neighbor in range(1, car_num):
            neighbor_feature = features[b, neighbor][None]
            if img_metas[0]["vehicle_id"][0] == img_metas[0]["vehicle_id"][neighbor]:
                neighbor_feature = jnp.zeros_like(neighbor_feature)
            else:
                # TODO(synk): kornia warp_affine3d neighbor alignment not translated.
                raise NotImplementedError("warp_affine3d neighbor alignment not implemented")
            fuse_feats.append(neighbor_feature)
        fuse_inputs.append(jnp.concatenate(fuse_feats, axis=1))  # channel concat
    fused = jnp.concatenate(fuse_inputs, axis=0)                 # batched over b

    occ_fuse = None
    n_fuse = len(params["fuse_w"])
    for k in range(n_fuse):
        occ_w = params["occ_w"][len(out_indices) - 1] if k == n_fuse - 1 else None
        fused, occ_k = conv3d_gn_relu_pallas(fused, params["fuse_w"][k],
                                             params["fuse_gn_g"][k],
                                             params["fuse_gn_b"][k], occ_w=occ_w)
        if occ_k is not None:
            occ_fuse = occ_k
    outputs.append(fused)
    occ_for_output.append(occ_fuse)

    # ---- occ heads (fused where possible; fallback 1x1 kernel otherwise) ----
    occ_preds = []
    for idx, feat in enumerate(outputs):
        occ = occ_for_output[idx]
        if occ is None:
            occ = occ_1x1_pallas(feat, params["occ_w"][idx])
        occ_preds.append(occ)

    return {"volume_embed": volume_embed, "occ_preds": occ_preds}


# ----------------------------------------------------------------------------
# Deterministic parameter init (synthetic, shapes follow __init__, torch layouts)
# ----------------------------------------------------------------------------
def init_params(key, cfg):
    keys = iter(jax.random.split(key, 64))

    def nrm(shape, scale=0.05):
        return jax.random.normal(next(keys), shape, jnp.float32) * scale

    fpn = len(cfg["embed_dims"])
    p = {}
    p["transfer_w"] = [nrm((cfg["img_channels"][i], cfg["embed_dims"][i])) for i in range(fpn)]
    p["transfer_b"] = [nrm((cfg["embed_dims"][i],)) for i in range(fpn)]
    p["trans_proj_w"] = [nrm((cfg["embed_dims"][i], cfg["embed_dims"][i])) for i in range(fpn)]
    p["volume_embedding"] = [
        nrm((cfg["volume_h"][i] * cfg["volume_w"][i] * cfg["volume_z"][i],
             cfg["embed_dims"][i]), 1.0)
        for i in range(fpn)]

    p["deblock_w"], p["deblock_gn_g"], p["deblock_gn_b"] = [], [], []
    for i, s in enumerate(cfg["upsample_strides"]):
        cin, cout = cfg["conv_input"][i], cfg["conv_output"][i]
        if s > 1:
            p["deblock_w"].append(nrm((cin, cout, 2, 2, 2)))   # ConvTranspose3d weight
        else:
            p["deblock_w"].append(nrm((cout, cin, 3, 3, 3)))   # Conv3d weight
        p["deblock_gn_g"].append(jnp.ones((cout,), jnp.float32))
        p["deblock_gn_b"].append(jnp.zeros((cout,), jnp.float32))

    cf = cfg["conv_output"][6]
    cfa = cf * (cfg["max_connect_car"] + 1)
    fuse_ch = [(cfa, cfa), (cfa, cf), (cf, cf)]
    p["fuse_w"] = [nrm((b, a, 3, 3, 3)) for a, b in fuse_ch]
    p["fuse_gn_g"] = [jnp.ones((b,), jnp.float32) for _, b in fuse_ch]
    p["fuse_gn_b"] = [jnp.zeros((b,), jnp.float32) for _, b in fuse_ch]

    p["occ_w"] = [nrm((cfg["num_classes"], cfg["conv_output"][i])) for i in cfg["out_indices"]]
    return p


# ----------------------------------------------------------------------------
if __name__ == "__main__":
    cfg = dict(
        num_classes=4,
        volume_h=[8, 4], volume_w=[8, 4], volume_z=[4, 2],
        upsample_strides=[1, 2, 1, 2, 1, 2, 1],
        out_indices=[0, 2, 4, 6],
        conv_input=[32, 32, 16, 16, 16, 16, 16],
        conv_output=[32, 16, 16, 16, 16, 16, 16],
        embed_dims=[16, 32],
        img_channels=[32, 32],
        use_semantic=True,
        max_connect_car=0,
    )

    key = jax.random.PRNGKey(0)
    kp, kf0, kf1 = jax.random.split(key, 3)
    params = init_params(kp, cfg)

    bs, num_cam = 1, 4          # car_num = num_cam // 4 = 1
    mlvl_feats = [
        jax.random.normal(kf0, (bs, num_cam, cfg["img_channels"][0], 16, 16), jnp.float32),
        jax.random.normal(kf1, (bs, num_cam, cfg["img_channels"][1], 8, 8), jnp.float32),
    ]
    img_metas = [{
        "lidar2img": [np.eye(4, dtype=np.float32) for _ in range(num_cam)],
        "img_shape": [(128, 128, 3)] * num_cam,
        "trans2ego": [np.eye(4, dtype=np.float32) for _ in range(num_cam // 4)],
        "vehicle_id": [0],
    }]

    outs = v2v_occ_head_forward(params, mlvl_feats, img_metas, cfg)
    for t in outs["occ_preds"]:
        jax.block_until_ready(t)
    for t in outs["volume_embed"]:
        jax.block_until_ready(t)
    print("KERNEL_OK")
</pallas_src>

<mosaic_0001>
module attributes {stable_mosaic.version = 11 : i64} {
  func.func @kernel(%arg0: i32, %arg1: memref<1024x32xbf16, #tpu.memory_space<vmem>>, %arg2: memref<32x16xbf16, #tpu.memory_space<vmem>>, %arg3: memref<1x16xf32, #tpu.memory_space<vmem>>, %arg4: memref<1024x16xf32, #tpu.memory_space<vmem>>) attributes {dimension_semantics = [#tpu.dimension_semantics<parallel>], iteration_bounds = array<i64: 1>, scalar_prefetch = 0 : i64, scratch_operands = 0 : i64, tpu.core_type = #tpu.core_type<tc>, window_params = [{transform_indices = @transform_0, window_bounds = array<i64: 1024, 32>}, {pipeline_mode = #tpu.pipeline_mode<synchronous>, transform_indices = @transform_1, window_bounds = array<i64: 32, 16>}, {pipeline_mode = #tpu.pipeline_mode<synchronous>, transform_indices = @transform_2, window_bounds = array<i64: 1, 16>}, {transform_indices = @transform_3, window_bounds = array<i64: 1024, 16>}]} {
    %c0 = arith.constant 0 : index
    %c0_0 = arith.constant 0 : index
    %0 = vector.load %arg1[%c0, %c0_0] : memref<1024x32xbf16, #tpu.memory_space<vmem>>, vector<1024x32xbf16>
    %c0_1 = arith.constant 0 : index
    %c0_2 = arith.constant 0 : index
    %1 = vector.load %arg2[%c0_1, %c0_2] : memref<32x16xbf16, #tpu.memory_space<vmem>>, vector<32x16xbf16>
    %cst = arith.constant dense<0.000000e+00> : vector<1024x16xf32>
    %2 = tpu.matmul %0, %1, %cst {dimension_numbers = #tpu.dot_dimension_numbers<[1], [0], [0], [1], [0, 0, 1, 1], [], []>} : vector<1024x32xbf16>, vector<32x16xbf16>, vector<1024x16xf32> -> vector<1024x16xf32>
    %c0_3 = arith.constant 0 : index
    %c0_4 = arith.constant 0 : index
    %3 = vector.load %arg3[%c0_3, %c0_4] : memref<1x16xf32, #tpu.memory_space<vmem>>, vector<1x16xf32>
    %4 = vector.broadcast %3 : vector<1x16xf32> to vector<1024x16xf32>
    %5 = arith.addf %2, %4 : vector<1024x16xf32>
    %cst_5 = arith.constant 0.000000e+00 : f32
    %6 = vector.broadcast %cst_5 : f32 to vector<1024x16xf32>
    %7 = arith.maximumf %5, %6 : vector<1024x16xf32>
    %c0_6 = arith.constant 0 : index
    %c0_7 = arith.constant 0 : index
    %8 = vector.load %arg4[%c0_6, %c0_7] : memref<1024x16xf32, #tpu.memory_space<vmem>>, vector<1024x16xf32>
    tpu.vector_store %arg4[%c0_6, %c0_7], %7 {strides = array<i32>} : memref<1024x16xf32, #tpu.memory_space<vmem>>, vector<1024x16xf32>,
    return
  }
  func.func @transform_0(%arg0: i32) -> (i32, i32) {
    %c0_i32 = arith.constant 0 : i32
    %c0_i32_0 = arith.constant 0 : i32
    return %arg0, %c0_i32 : i32, i32
  }
  func.func @transform_1(%arg0: i32) -> (i32, i32) {
    %c0_i32 = arith.constant 0 : i32
    %c0_i32_0 = arith.constant 0 : i32
    %c0_i32_1 = arith.constant 0 : i32
    return %c0_i32, %c0_i32_0 : i32, i32
  }
  func.func @transform_2(%arg0: i32) -> (i32, i32) {
    %c0_i32 = arith.constant 0 : i32
    %c0_i32_0 = arith.constant 0 : i32
    %c0_i32_1 = arith.constant 0 : i32
    return %c0_i32, %c0_i32_0 : i32, i32
  }
  func.func @transform_3(%arg0: i32) -> (i32, i32) {
    %c0_i32 = arith.constant 0 : i32
    %c0_i32_0 = arith.constant 0 : i32
    return %arg0, %c0_i32 : i32, i32
  }
}

</mosaic_0001>

<bundles_post_ra>
// kernel: tpu_custom_call.1
= control target key start
LH: loop header
LB: loop body
LE: loop exit
PB: predicated region body
PF: predicated region fallthrough
CT: control target
= control target key end

     0   :  { %vm486_vm0 = vcmask 261120   ;;  %vm1352_vm1 = vcmask 130048   ;;  %s2811_s1 = inlined_call_operand.vmem [shape: bf16[32,16], index: 1, kind: input, shape index: {}]   ;;  %s2812_s0 = inlined_call_operand.vmem [shape: bf16[1024,32], index: 0, kind: input, shape index: {}]   ;;  %s2813_s2 = inlined_call_operand.vmem [shape: f32[1,16], index: 2, kind: input, shape index: {}]   ;;  %s2814_s3 = inlined_call_operand.vmem [shape: f32[1024,16], index: 3, kind: output, shape index: {}]  }
   0x1   :  { %v1818_v0 = vld [vmem:[%s2811_s1 + $0x8] sm:$0xff]   ;;  %v1819_v1 = vld [vmem:[%s2811_s1] sm:$0xff]   ;;  %v1824_v6 = vld [vmem:[%s2812_s0 + $0x10] sm:$0xff]  }
   0x2   :  { %1682 = vmatprep.subr.bf16.mxu0 %v1818_v0  ;;  %1814 = vmatprep.subr.bf16.mxu1 %v1818_v0  ;;  %v1820_v2 = vld [vmem:[%s2812_s0] sm:$0xff]   ;;  %v1822_v4 = vld [vmem:[%s2812_s0 + $0x8] sm:$0xff]   ;;  %v1825_v7 = vld [vmem:[%s2812_s0 + $0x110] sm:$0xff]  }
   0x3   :  { %1683 = vmatpush3.bf16.msra.mxu0 %v1818_v0  ;;  %1816 = vmatpush3.bf16.msra.mxu1 %v1818_v0  ;;  %v1821_v3 = vld [vmem:[%s2812_s0 + $0x100] sm:$0xff]   ;;  %v1823_v5 = vld [vmem:[%s2812_s0 + $0x108] sm:$0xff]   ;;  %v1826_v8 = vld [vmem:[%s2812_s0 + $0x18] sm:$0xff]  }
   0x4   :  { %1684 = vmatprep.subr.bf16.mxu0 %v1819_v1  ;;  %1815 = vmatprep.subr.bf16.mxu1 %v1819_v1  ;;  %v1827_v9 = vld [vmem:[%s2812_s0 + $0x118] sm:$0xff]   ;;  %v1828_v10 = vld [vmem:[%s2812_s0 + $0x20] sm:$0xff]   ;;  %v1830_v12 = vld [vmem:[%s2812_s0 + $0x28] sm:$0xff]  }
   0x5   :  { %1686 = vmatprep.mubr.msk.bf16.mxu0 %vm486_vm0, %v1820_v2  ;;  %1750 = vmatprep.mubr.msk.bf16.mxu1 %vm486_vm0, %v1821_v3  ;;  %v1829_v11 = vld [vmem:[%s2812_s0 + $0x120] sm:$0xff]   ;;  %v1831_v13 = vld [vmem:[%s2812_s0 + $0x128] sm:$0xff]   ;;  %v1832_v14 = vld [vmem:[%s2812_s0 + $0x30] sm:$0xff]  }
   0x6   :  { %v1833_v15 = vld [vmem:[%s2812_s0 + $0x130] sm:$0xff]   ;;  %v1834_v16 = vld [vmem:[%s2812_s0 + $0x38] sm:$0xff]   ;;  %v1836_v18 = vld [vmem:[%s2812_s0 + $0x40] sm:$0xff]  }
   0x7   :  { %1685 = vmatpush3.bf16.msra.mxu0 %v1819_v1  ;;  %1817 = vmatpush3.bf16.msra.mxu1 %v1819_v1  ;;  %v1835_v17 = vld [vmem:[%s2812_s0 + $0x138] sm:$0xff]   ;;  %v1837_v19 = vld [vmem:[%s2812_s0 + $0x140] sm:$0xff]   ;;  %v1838_v20 = vld [vmem:[%s2812_s0 + $0x48] sm:$0xff]  }
   0x8   :  { %v1839_v21 = vld [vmem:[%s2812_s0 + $0x148] sm:$0xff]   ;;  %v1840_v22 = vld [vmem:[%s2812_s0 + $0x50] sm:$0xff]   ;;  %v1842_v24 = vld [vmem:[%s2812_s0 + $0x58] sm:$0xff]  }
   0x9   :  { %v1841_v23 = vld [vmem:[%s2812_s0 + $0x150] sm:$0xff]   ;;  %v1843_v25 = vld [vmem:[%s2812_s0 + $0x158] sm:$0xff]   ;;  %v1844_v26 = vld [vmem:[%s2812_s0 + $0x60] sm:$0xff]  }
   0xa   :  { %1687 = vmatmul.mubr.msk.bf16.vlgmr.msra.gmra.mxu0 %vm486_vm0, %v1822_v4  ;;  %1751 = vmatmul.mubr.msk.bf16.vlgmr.msra.gmra.mxu1 %vm486_vm0, %v1823_v5  ;;  %v1845_v27 = vld [vmem:[%s2812_s0 + $0x160] sm:$0xff]   ;;  %v1846_v28 = vld [vmem:[%s2812_s0 + $0x68] sm:$0xff]   ;;  %v1848_v30 = vld [vmem:[%s2812_s0 + $0x70] sm:$0xff]  }
   0xb   :  { %1690 = vmatprep.mubr.msk.bf16.mxu0 %vm486_vm0, %v1824_v6  ;;  %1754 = vmatprep.mubr.msk.bf16.mxu1 %vm486_vm0, %v1825_v7  ;;  %v1847_v29 = vld [vmem:[%s2812_s0 + $0x168] sm:$0xff]   ;;  %v1849_v31 = vld [vmem:[%s2812_s0 + $0x170] sm:$0xff]   ;;  %v1850_v32 = vld [vmem:[%s2812_s0 + $0x78] sm:$0xff]  }
   0xc   :  { %v1851_v33 = vld [vmem:[%s2812_s0 + $0x178] sm:$0xff]   ;;  %v1852_v34 = vld [vmem:[%s2812_s0 + $0x80] sm:$0xff]   ;;  %v1854_v36 = vld [vmem:[%s2812_s0 + $0x88] sm:$0xff]  }
   0xd   :  { %v1853_v35 = vld [vmem:[%s2812_s0 + $0x180] sm:$0xff]   ;;  %v1855_v37 = vld [vmem:[%s2812_s0 + $0x188] sm:$0xff]   ;;  %v1856_v38 = vld [vmem:[%s2812_s0 + $0x90] sm:$0xff]  }
   0xe   :  { %v1857_v39 = vld [vmem:[%s2812_s0 + $0x190] sm:$0xff]   ;;  %v1858_v40 = vld [vmem:[%s2812_s0 + $0x98] sm:$0xff]   ;;  %v1860_v42 = vld [vmem:[%s2812_s0 + $0xa0] sm:$0xff]  }
   0xf   :  { %v1859_v41 = vld [vmem:[%s2812_s0 + $0x198] sm:$0xff]   ;;  %v1861_v43 = vld [vmem:[%s2812_s0 + $0x1a0] sm:$0xff]   ;;  %v1862_v44 = vld [vmem:[%s2812_s0 + $0xa8] sm:$0xff]  }
  0x10   :  { %v1863_v45 = vld [vmem:[%s2812_s0 + $0x1a8] sm:$0xff]   ;;  %v1864_v46 = vld [vmem:[%s2812_s0 + $0xb0] sm:$0xff]   ;;  %v1866_v48 = vld [vmem:[%s2812_s0 + $0xb8] sm:$0xff]  }
  0x11   :  { %v1865_v47 = vld [vmem:[%s2812_s0 + $0x1b0] sm:$0xff]   ;;  %v1867_v49 = vld [vmem:[%s2812_s0 + $0x1b8] sm:$0xff]   ;;  %v1868_v50 = vld [vmem:[%s2812_s0 + $0xc0] sm:$0xff]  }
  0x12   :  { %1691 = vmatmul.mubr.msk.bf16.gmra.mxu0 %vm486_vm0, %v1826_v8  ;;  %1755 = vmatmul.mubr.msk.bf16.gmra.mxu1 %vm486_vm0, %v1827_v9  ;;  %v1869_v51 = vld [vmem:[%s2812_s0 + $0x1c0] sm:$0xff]   ;;  %v1870_v52 = vld [vmem:[%s2812_s0 + $0xc8] sm:$0xff]   ;;  %v1872_v54 = vld [vmem:[%s2812_s0 + $0xd0] sm:$0xff]  }
  0x13   :  { %1694 = vmatprep.mubr.msk.bf16.mxu0 %vm486_vm0, %v1828_v10  ;;  %1758 = vmatprep.mubr.msk.bf16.mxu1 %vm486_vm0, %v1829_v11  ;;  %v1871_v53 = vld [vmem:[%s2812_s0 + $0x1c8] sm:$0xff]   ;;  %v1873_v55 = vld [vmem:[%s2812_s0 + $0x1d0] sm:$0xff]   ;;  %v1874_v56 = vld [vmem:[%s2812_s0 + $0xd8] sm:$0xff]  }
  0x14   :  { %v1875_v57 = vld [vmem:[%s2812_s0 + $0x1d8] sm:$0xff]   ;;  %v1876_v58 = vld [vmem:[%s2812_s0 + $0xe0] sm:$0xff]   ;;  %v1878_v60 = vld [vmem:[%s2812_s0 + $0xe8] sm:$0xff]  }
  0x15   :  { %v1877_v59 = vld [vmem:[%s2812_s0 + $0x1e0] sm:$0xff]   ;;  %v1879_v61 = vld [vmem:[%s2812_s0 + $0x1e8] sm:$0xff]   ;;  %v1880_v62 = vld [vmem:[%s2812_s0 + $0xf0] sm:$0xff]  }
  0x16   :  { %v1881_v63 = vld [vmem:[%s2812_s0 + $0x1f0] sm:$0xff]   ;;  %v1882_v0 = vld [vmem:[%s2812_s0 + $0xf8] sm:$0xff]   ;;  %v2169_v2 = vld [vmem:[%s2813_s2] ss:$0 sm:$0xff] }
  0x17   :  { %v1883_v1 = vld [vmem:[%s2812_s0 + $0x1f8] sm:$0xff]  }
  0x1a   :  { %1695 = vmatmul.mubr.msk.bf16.gmra.mxu0 %vm486_vm0, %v1830_v12  ;;  %1759 = vmatmul.mubr.msk.bf16.gmra.mxu1 %vm486_vm0, %v1831_v13 }
  0x1b   :  { %1698 = vmatprep.mubr.msk.bf16.mxu0 %vm486_vm0, %v1832_v14  ;;  %1762 = vmatprep.mubr.msk.bf16.mxu1 %vm486_vm0, %v1833_v15 }
  0x22   :  { %1699 = vmatmul.mubr.msk.bf16.gmra.mxu0 %vm486_vm0, %v1834_v16  ;;  %1763 = vmatmul.mubr.msk.bf16.gmra.mxu1 %vm486_vm0, %v1835_v17 }
  0x23   :  { %1702 = vmatprep.mubr.msk.bf16.mxu0 %vm486_vm0, %v1836_v18  ;;  %1766 = vmatprep.mubr.msk.bf16.mxu1 %vm486_vm0, %v1837_v19 }
  0x2a   :  { %1703 = vmatmul.mubr.msk.bf16.gmra.mxu0 %vm486_vm0, %v1838_v20  ;;  %1767 = vmatmul.mubr.msk.bf16.gmra.mxu1 %vm486_vm0, %v1839_v21 }
  0x2b   :  { %1706 = vmatprep.mubr.msk.bf16.mxu0 %vm486_vm0, %v1840_v22  ;;  %1770 = vmatprep.mubr.msk.bf16.mxu1 %vm486_vm0, %v1841_v23 }
  0x32   :  { %1707 = vmatmul.mubr.msk.bf16.gmra.mxu0 %vm486_vm0, %v1842_v24  ;;  %1771 = vmatmul.mubr.msk.bf16.gmra.mxu1 %vm486_vm0, %v1843_v25 }
  0x33   :  { %1710 = vmatprep.mubr.msk.bf16.mxu0 %vm486_vm0, %v1844_v26  ;;  %1774 = vmatprep.mubr.msk.bf16.mxu1 %vm486_vm0, %v1845_v27 }
  0x3a   :  { %1711 = vmatmul.mubr.msk.bf16.gmra.mxu0 %vm486_vm0, %v1846_v28  ;;  %1775 = vmatmul.mubr.msk.bf16.gmra.mxu1 %vm486_vm0, %v1847_v29 }
  0x3b   :  { %1714 = vmatprep.mubr.msk.bf16.mxu0 %vm486_vm0, %v1848_v30  ;;  %1778 = vmatprep.mubr.msk.bf16.mxu1 %vm486_vm0, %v1849_v31 }
  0x42   :  { %1715 = vmatmul.mubr.msk.bf16.gmra.mxu0 %vm486_vm0, %v1850_v32  ;;  %1779 = vmatmul.mubr.msk.bf16.gmra.mxu1 %vm486_vm0, %v1851_v33 }
  0x43   :  { %1718 = vmatprep.mubr.msk.bf16.mxu0 %vm486_vm0, %v1852_v34  ;;  %1782 = vmatprep.mubr.msk.bf16.mxu1 %vm486_vm0, %v1853_v35 }
  0x4a   :  { %1719 = vmatmul.mubr.msk.bf16.gmra.mxu0 %vm486_vm0, %v1854_v36  ;;  %1783 = vmatmul.mubr.msk.bf16.gmra.mxu1 %vm486_vm0, %v1855_v37 }
  0x4b   :  { %1722 = vmatprep.mubr.msk.bf16.mxu0 %vm486_vm0, %v1856_v38  ;;  %1786 = vmatprep.mubr.msk.bf16.mxu1 %vm486_vm0, %v1857_v39 }
  0x52   :  { %1723 = vmatmul.mubr.msk.bf16.gmra.mxu0 %vm486_vm0, %v1858_v40  ;;  %1787 = vmatmul.mubr.msk.bf16.gmra.mxu1 %vm486_vm0, %v1859_v41 }
  0x53   :  { %1726 = vmatprep.mubr.msk.bf16.mxu0 %vm486_vm0, %v1860_v42  ;;  %1790 = vmatprep.mubr.msk.bf16.mxu1 %vm486_vm0, %v1861_v43 }
  0x5a   :  { %1727 = vmatmul.mubr.msk.bf16.gmra.mxu0 %vm486_vm0, %v1862_v44  ;;  %1791 = vmatmul.mubr.msk.bf16.gmra.mxu1 %vm486_vm0, %v1863_v45 }
  0x5b   :  { %1730 = vmatprep.mubr.msk.bf16.mxu0 %vm486_vm0, %v1864_v46  ;;  %1794 = vmatprep.mubr.msk.bf16.mxu1 %vm486_vm0, %v1865_v47 }
  0x62   :  { %1731 = vmatmul.mubr.msk.bf16.gmra.mxu0 %vm486_vm0, %v1866_v48  ;;  %1795 = vmatmul.mubr.msk.bf16.gmra.mxu1 %vm486_vm0, %v1867_v49 }
  0x63   :  { %1734 = vmatprep.mubr.msk.bf16.mxu0 %vm486_vm0, %v1868_v50  ;;  %1798 = vmatprep.mubr.msk.bf16.mxu1 %vm486_vm0, %v1869_v51 }
  0x6a   :  { %1735 = vmatmul.mubr.msk.bf16.gmra.mxu0 %vm486_vm0, %v1870_v52  ;;  %1799 = vmatmul.mubr.msk.bf16.gmra.mxu1 %vm486_vm0, %v1871_v53 }
  0x6b   :  { %1738 = vmatprep.mubr.msk.bf16.mxu0 %vm486_vm0, %v1872_v54  ;;  %1802 = vmatprep.mubr.msk.bf16.mxu1 %vm486_vm0, %v1873_v55 }
  0x72   :  { %1739 = vmatmul.mubr.msk.bf16.gmra.mxu0 %vm486_vm0, %v1874_v56  ;;  %1803 = vmatmul.mubr.msk.bf16.gmra.mxu1 %vm486_vm0, %v1875_v57 }
  0x73   :  { %1742 = vmatprep.mubr.msk.bf16.mxu0 %vm486_vm0, %v1876_v58  ;;  %1806 = vmatprep.mubr.msk.bf16.mxu1 %vm486_vm0, %v1877_v59 }
  0x7a   :  { %1743 = vmatmul.mubr.msk.bf16.gmra.mxu0 %vm486_vm0, %v1878_v60  ;;  %1807 = vmatmul.mubr.msk.bf16.gmra.mxu1 %vm486_vm0, %v1879_v61 }
  0x7b   :  { %1746 = vmatprep.mubr.msk.bf16.mxu0 %vm486_vm0, %v1880_v62  ;;  %1810 = vmatprep.mubr.msk.bf16.mxu1 %vm486_vm0, %v1881_v63 }
  0x82   :  { %1747 = vmatmul.mubr.msk.bf16.gmra.mxu0 %vm486_vm0, %v1882_v0  ;;  %1811 = vmatmul.mubr.msk.bf16.gmra.mxu1 %vm486_vm0, %v1883_v1 }
  0xca   :  { %v1688_v3 = vpop.f32.mrf.mxu0  ;;  %v1752_v4 = vpop.f32.mrf.mxu1 }
  0xcb   :  { %v722_v5 = vadd.f32 %v1688_v3, %v2169_v2  ;;  %v978_v6 = vadd.f32 %v1752_v4, %v2169_v2 }
  0xcc   :  { %v713_v7 = vpop.f32.mrf.mxu0  ;;  %v969_v8 = vpop.f32.mrf.mxu1 }
  0xcd   :  { %v1226_v9 = vmax.f32 %v722_v5, 0.0  ;;  %v1290_v10 = vmax.f32 %v978_v6, 0.0  ;;  %v714_v11 = vadd.f32 %v2169_v2, %v713_v7  ;;  %v970_v12 = vadd.f32 %v2169_v2, %v969_v8 }
  0xce   :  { %v1689_v13 = vpop.f32.mrf.mxu0  ;;  %v1753_v14 = vpop.f32.mrf.mxu1 }
  0xcf   :  { %1355 = vst.msk [vmem:[%s2814_s3 + $0x10] sm:$0xff] %vm1352_vm1, %v1226_v9  ;;  %1419 = vst.msk [vmem:[%s2814_s3 + $0x210] sm:$0xff] %vm1352_vm1, %v1290_v10  ;;  %v1224_v15 = vmax.f32 %v714_v11, 0.0  ;;  %v1288_v16 = vmax.f32 %v970_v12, 0.0  ;;  %v725_v17 = vadd.f32 %v1689_v13, %v2169_v2  ;;  %v981_v18 = vadd.f32 %v1753_v14, %v2169_v2 }
  0xd0   :  { %v716_v19 = vpop.f32.mrf.mxu0  ;;  %v972_v20 = vpop.f32.mrf.mxu1 }
  0xd1   :  { %1353 = vst.msk [vmem:[%s2814_s3] sm:$0xff] %vm1352_vm1, %v1224_v15  ;;  %1417 = vst.msk [vmem:[%s2814_s3 + $0x200] sm:$0xff] %vm1352_vm1, %v1288_v16  ;;  %v1227_v21 = vmax.f32 %v725_v17, 0.0  ;;  %v1291_v22 = vmax.f32 %v981_v18, 0.0  ;;  %v717_v23 = vadd.f32 %v2169_v2, %v716_v19  ;;  %v973_v24 = vadd.f32 %v2169_v2, %v972_v20 }
  0xd2   :  { %v1692_v25 = vpop.f32.mrf.mxu0  ;;  %v1756_v26 = vpop.f32.mrf.mxu1 }
  0xd3   :  { %1356 = vst.msk [vmem:[%s2814_s3 + $0x18] sm:$0xff] %vm1352_vm1, %v1227_v21  ;;  %1420 = vst.msk [vmem:[%s2814_s3 + $0x218] sm:$0xff] %vm1352_vm1, %v1291_v22  ;;  %v1225_v27 = vmax.f32 %v717_v23, 0.0  ;;  %v1289_v28 = vmax.f32 %v973_v24, 0.0  ;;  %v738_v29 = vadd.f32 %v1692_v25, %v2169_v2  ;;  %v994_v30 = vadd.f32 %v1756_v26, %v2169_v2 }
  0xd4   :  { %v729_v31 = vpop.f32.mrf.mxu0  ;;  %v985_v32 = vpop.f32.mrf.mxu1 }
  0xd5   :  { %1354 = vst.msk [vmem:[%s2814_s3 + $0x8] sm:$0xff] %vm1352_vm1, %v1225_v27  ;;  %1418 = vst.msk [vmem:[%s2814_s3 + $0x208] sm:$0xff] %vm1352_vm1, %v1289_v28  ;;  %v1230_v33 = vmax.f32 %v738_v29, 0.0  ;;  %v1294_v34 = vmax.f32 %v994_v30, 0.0  ;;  %v730_v35 = vadd.f32 %v2169_v2, %v729_v31  ;;  %v986_v36 = vadd.f32 %v2169_v2, %v985_v32 }
  0xd6   :  { %v1693_v37 = vpop.f32.mrf.mxu0  ;;  %v1757_v38 = vpop.f32.mrf.mxu1 }
  0xd7   :  { %1359 = vst.msk [vmem:[%s2814_s3 + $0x30] sm:$0xff] %vm1352_vm1, %v1230_v33  ;;  %1423 = vst.msk [vmem:[%s2814_s3 + $0x230] sm:$0xff] %vm1352_vm1, %v1294_v34  ;;  %v1228_v39 = vmax.f32 %v730_v35, 0.0  ;;  %v1292_v40 = vmax.f32 %v986_v36, 0.0  ;;  %v741_v41 = vadd.f32 %v1693_v37, %v2169_v2  ;;  %v997_v42 = vadd.f32 %v1757_v38, %v2169_v2 }
  0xd8   :  { %v732_v43 = vpop.f32.mrf.mxu0  ;;  %v988_v44 = vpop.f32.mrf.mxu1 }
  0xd9   :  { %1357 = vst.msk [vmem:[%s2814_s3 + $0x20] sm:$0xff] %vm1352_vm1, %v1228_v39  ;;  %1421 = vst.msk [vmem:[%s2814_s3 + $0x220] sm:$0xff] %vm1352_vm1, %v1292_v40  ;;  %v1231_v45 = vmax.f32 %v741_v41, 0.0  ;;  %v1295_v46 = vmax.f32 %v997_v42, 0.0  ;;  %v733_v47 = vadd.f32 %v2169_v2, %v732_v43  ;;  %v989_v48 = vadd.f32 %v2169_v2, %v988_v44 }
  0xda   :  { %v1696_v49 = vpop.f32.mrf.mxu0  ;;  %v1760_v50 = vpop.f32.mrf.mxu1 }
  0xdb   :  { %1360 = vst.msk [vmem:[%s2814_s3 + $0x38] sm:$0xff] %vm1352_vm1, %v1231_v45  ;;  %1424 = vst.msk [vmem:[%s2814_s3 + $0x238] sm:$0xff] %vm1352_vm1, %v1295_v46  ;;  %v1229_v51 = vmax.f32 %v733_v47, 0.0  ;;  %v1293_v52 = vmax.f32 %v989_v48, 0.0  ;;  %v754_v53 = vadd.f32 %v1696_v49, %v2169_v2  ;;  %v1010_v54 = vadd.f32 %v1760_v50, %v2169_v2 }
  0xdc   :  { %v745_v55 = vpop.f32.mrf.mxu0  ;;  %v1001_v56 = vpop.f32.mrf.mxu1 }
  0xdd   :  { %1358 = vst.msk [vmem:[%s2814_s3 + $0x28] sm:$0xff] %vm1352_vm1, %v1229_v51  ;;  %1422 = vst.msk [vmem:[%s2814_s3 + $0x228] sm:$0xff] %vm1352_vm1, %v1293_v52  ;;  %v1234_v57 = vmax.f32 %v754_v53, 0.0  ;;  %v1298_v58 = vmax.f32 %v1010_v54, 0.0  ;;  %v746_v59 = vadd.f32 %v2169_v2, %v745_v55  ;;  %v1002_v60 = vadd.f32 %v2169_v2, %v1001_v56 }
  0xde   :  { %v1697_v61 = vpop.f32.mrf.mxu0  ;;  %v1761_v62 = vpop.f32.mrf.mxu1 }
  0xdf   :  { %1363 = vst.msk [vmem:[%s2814_s3 + $0x50] sm:$0xff] %vm1352_vm1, %v1234_v57  ;;  %1427 = vst.msk [vmem:[%s2814_s3 + $0x250] sm:$0xff] %vm1352_vm1, %v1298_v58  ;;  %v1232_v63 = vmax.f32 %v746_v59, 0.0  ;;  %v1296_v0 = vmax.f32 %v1002_v60, 0.0  ;;  %v757_v1 = vadd.f32 %v1697_v61, %v2169_v2  ;;  %v1013_v3 = vadd.f32 %v1761_v62, %v2169_v2 }
  0xe0   :  { %v748_v4 = vpop.f32.mrf.mxu0  ;;  %v1004_v5 = vpop.f32.mrf.mxu1 }
  0xe1   :  { %1361 = vst.msk [vmem:[%s2814_s3 + $0x40] sm:$0xff] %vm1352_vm1, %v1232_v63  ;;  %1425 = vst.msk [vmem:[%s2814_s3 + $0x240] sm:$0xff] %vm1352_vm1, %v1296_v0  ;;  %v1235_v6 = vmax.f32 %v757_v1, 0.0  ;;  %v1299_v7 = vmax.f32 %v1013_v3, 0.0  ;;  %v749_v8 = vadd.f32 %v2169_v2, %v748_v4  ;;  %v1005_v9 = vadd.f32 %v2169_v2, %v1004_v5 }
  0xe2   :  { %v1700_v10 = vpop.f32.mrf.mxu0  ;;  %v1764_v11 = vpop.f32.mrf.mxu1 }
  0xe3   :  { %1364 = vst.msk [vmem:[%s2814_s3 + $0x58] sm:$0xff] %vm1352_vm1, %v1235_v6  ;;  %1428 = vst.msk [vmem:[%s2814_s3 + $0x258] sm:$0xff] %vm1352_vm1, %v1299_v7  ;;  %v1233_v12 = vmax.f32 %v749_v8, 0.0  ;;  %v1297_v13 = vmax.f32 %v1005_v9, 0.0  ;;  %v770_v14 = vadd.f32 %v1700_v10, %v2169_v2  ;;  %v1026_v15 = vadd.f32 %v1764_v11, %v2169_v2 }
  0xe4   :  { %v761_v16 = vpop.f32.mrf.mxu0  ;;  %v1017_v17 = vpop.f32.mrf.mxu1 }
  0xe5   :  { %1362 = vst.msk [vmem:[%s2814_s3 + $0x48] sm:$0xff] %vm1352_vm1, %v1233_v12  ;;  %1426 = vst.msk [vmem:[%s2814_s3 + $0x248] sm:$0xff] %vm1352_vm1, %v1297_v13  ;;  %v1238_v18 = vmax.f32 %v770_v14, 0.0  ;;  %v1302_v19 = vmax.f32 %v1026_v15, 0.0  ;;  %v762_v20 = vadd.f32 %v2169_v2, %v761_v16  ;;  %v1018_v21 = vadd.f32 %v2169_v2, %v1017_v17 }
  0xe6   :  { %v1701_v22 = vpop.f32.mrf.mxu0  ;;  %v1765_v23 = vpop.f32.mrf.mxu1 }
  0xe7   :  { %1367 = vst.msk [vmem:[%s2814_s3 + $0x70] sm:$0xff] %vm1352_vm1, %v1238_v18  ;;  %1431 = vst.msk [vmem:[%s2814_s3 + $0x270] sm:$0xff] %vm1352_vm1, %v1302_v19  ;;  %v1236_v24 = vmax.f32 %v762_v20, 0.0  ;;  %v1300_v25 = vmax.f32 %v1018_v21, 0.0  ;;  %v773_v26 = vadd.f32 %v1701_v22, %v2169_v2  ;;  %v1029_v27 = vadd.f32 %v1765_v23, %v2169_v2 }
  0xe8   :  { %v764_v28 = vpop.f32.mrf.mxu0  ;;  %v1020_v29 = vpop.f32.mrf.mxu1 }
  0xe9   :  { %1365 = vst.msk [vmem:[%s2814_s3 + $0x60] sm:$0xff] %vm1352_vm1, %v1236_v24  ;;  %1429 = vst.msk [vmem:[%s2814_s3 + $0x260] sm:$0xff] %vm1352_vm1, %v1300_v25  ;;  %v1239_v30 = vmax.f32 %v773_v26, 0.0  ;;  %v1303_v31 = vmax.f32 %v1029_v27, 0.0  ;;  %v765_v32 = vadd.f32 %v2169_v2, %v764_v28  ;;  %v1021_v33 = vadd.f32 %v2169_v2, %v1020_v29 }
  0xea   :  { %v1704_v34 = vpop.f32.mrf.mxu0  ;;  %v1768_v35 = vpop.f32.mrf.mxu1 }
  0xeb   :  { %1368 = vst.msk [vmem:[%s2814_s3 + $0x78] sm:$0xff] %vm1352_vm1, %v1239_v30  ;;  %1432 = vst.msk [vmem:[%s2814_s3 + $0x278] sm:$0xff] %vm1352_vm1, %v1303_v31  ;;  %v1237_v36 = vmax.f32 %v765_v32, 0.0  ;;  %v1301_v37 = vmax.f32 %v1021_v33, 0.0  ;;  %v786_v38 = vadd.f32 %v1704_v34, %v2169_v2  ;;  %v1042_v39 = vadd.f32 %v1768_v35, %v2169_v2 }
  0xec   :  { %v777_v40 = vpop.f32.mrf.mxu0  ;;  %v1033_v41 = vpop.f32.mrf.mxu1 }
  0xed   :  { %1366 = vst.msk [vmem:[%s2814_s3 + $0x68] sm:$0xff] %vm1352_vm1, %v1237_v36  ;;  %1430 = vst.msk [vmem:[%s2814_s3 + $0x268] sm:$0xff] %vm1352_vm1, %v1301_v37  ;;  %v1242_v42 = vmax.f32 %v786_v38, 0.0  ;;  %v1306_v43 = vmax.f32 %v1042_v39, 0.0  ;;  %v778_v44 = vadd.f32 %v2169_v2, %v777_v40  ;;  %v1034_v45 = vadd.f32 %v2169_v2, %v1033_v41 }
  0xee   :  { %v1705_v46 = vpop.f32.mrf.mxu0  ;;  %v1769_v47 = vpop.f32.mrf.mxu1 }
  0xef   :  { %1371 = vst.msk [vmem:[%s2814_s3 + $0x90] sm:$0xff] %vm1352_vm1, %v1242_v42  ;;  %1435 = vst.msk [vmem:[%s2814_s3 + $0x290] sm:$0xff] %vm1352_vm1, %v1306_v43  ;;  %v1240_v48 = vmax.f32 %v778_v44, 0.0  ;;  %v1304_v49 = vmax.f32 %v1034_v45, 0.0  ;;  %v789_v50 = vadd.f32 %v1705_v46, %v2169_v2  ;;  %v1045_v51 = vadd.f32 %v1769_v47, %v2169_v2 }
  0xf0   :  { %v780_v52 = vpop.f32.mrf.mxu0  ;;  %v1036_v53 = vpop.f32.mrf.mxu1 }
  0xf1   :  { %1369 = vst.msk [vmem:[%s2814_s3 + $0x80] sm:$0xff] %vm1352_vm1, %v1240_v48  ;;  %1433 = vst.msk [vmem:[%s2814_s3 + $0x280] sm:$0xff] %vm1352_vm1, %v1304_v49  ;;  %v1243_v54 = vmax.f32 %v789_v50, 0.0  ;;  %v1307_v55 = vmax.f32 %v1045_v51, 0.0  ;;  %v781_v56 = vadd.f32 %v2169_v2, %v780_v52  ;;  %v1037_v57 = vadd.f32 %v2169_v2, %v1036_v53 }
  0xf2   :  { %v1708_v58 = vpop.f32.mrf.mxu0  ;;  %v1772_v59 = vpop.f32.mrf.mxu1 }
  0xf3   :  { %1372 = vst.msk [vmem:[%s2814_s3 + $0x98] sm:$0xff] %vm1352_vm1, %v1243_v54  ;;  %1436 = vst.msk [vmem:[%s2814_s3 + $0x298] sm:$0xff] %vm1352_vm1, %v1307_v55  ;;  %v1241_v60 = vmax.f32 %v781_v56, 0.0  ;;  %v1305_v61 = vmax.f32 %v1037_v57, 0.0  ;;  %v802_v62 = vadd.f32 %v1708_v58, %v2169_v2  ;;  %v1058_v63 = vadd.f32 %v1772_v59, %v2169_v2 }
  0xf4   :  { %v793_v0 = vpop.f32.mrf.mxu0  ;;  %v1049_v1 = vpop.f32.mrf.mxu1 }
  0xf5   :  { %1370 = vst.msk [vmem:[%s2814_s3 + $0x88] sm:$0xff] %vm1352_vm1, %v1241_v60  ;;  %1434 = vst.msk [vmem:[%s2814_s3 + $0x288] sm:$0xff] %vm1352_vm1, %v1305_v61  ;;  %v1246_v3 = vmax.f32 %v802_v62, 0.0  ;;  %v1310_v4 = vmax.f32 %v1058_v63, 0.0  ;;  %v794_v5 = vadd.f32 %v2169_v2, %v793_v0  ;;  %v1050_v6 = vadd.f32 %v2169_v2, %v1049_v1 }
  0xf6   :  { %v1709_v7 = vpop.f32.mrf.mxu0  ;;  %v1773_v8 = vpop.f32.mrf.mxu1 }
  0xf7   :  { %1375 = vst.msk [vmem:[%s2814_s3 + $0xb0] sm:$0xff] %vm1352_vm1, %v1246_v3  ;;  %1439 = vst.msk [vmem:[%s2814_s3 + $0x2b0] sm:$0xff] %vm1352_vm1, %v1310_v4  ;;  %v1244_v9 = vmax.f32 %v794_v5, 0.0  ;;  %v1308_v10 = vmax.f32 %v1050_v6, 0.0  ;;  %v805_v11 = vadd.f32 %v1709_v7, %v2169_v2  ;;  %v1061_v12 = vadd.f32 %v1773_v8, %v2169_v2 }
  0xf8   :  { %v796_v13 = vpop.f32.mrf.mxu0  ;;  %v1052_v14 = vpop.f32.mrf.mxu1 }
  0xf9   :  { %1373 = vst.msk [vmem:[%s2814_s3 + $0xa0] sm:$0xff] %vm1352_vm1, %v1244_v9  ;;  %1437 = vst.msk [vmem:[%s2814_s3 + $0x2a0] sm:$0xff] %vm1352_vm1, %v1308_v10  ;;  %v1247_v15 = vmax.f32 %v805_v11, 0.0  ;;  %v1311_v16 = vmax.f32 %v1061_v12, 0.0  ;;  %v797_v17 = vadd.f32 %v2169_v2, %v796_v13  ;;  %v1053_v18 = vadd.f32 %v2169_v2, %v1052_v14 }
  0xfa   :  { %v1712_v19 = vpop.f32.mrf.mxu0  ;;  %v1776_v20 = vpop.f32.mrf.mxu1 }
  0xfb   :  { %1376 = vst.msk [vmem:[%s2814_s3 + $0xb8] sm:$0xff] %vm1352_vm1, %v1247_v15  ;;  %1440 = vst.msk [vmem:[%s2814_s3 + $0x2b8] sm:$0xff] %vm1352_vm1, %v1311_v16  ;;  %v1245_v21 = vmax.f32 %v797_v17, 0.0  ;;  %v1309_v22 = vmax.f32 %v1053_v18, 0.0  ;;  %v818_v23 = vadd.f32 %v1712_v19, %v2169_v2  ;;  %v1074_v24 = vadd.f32 %v1776_v20, %v2169_v2 }
  0xfc   :  { %v809_v25 = vpop.f32.mrf.mxu0  ;;  %v1065_v26 = vpop.f32.mrf.mxu1 }
  0xfd   :  { %1374 = vst.msk [vmem:[%s2814_s3 + $0xa8] sm:$0xff] %vm1352_vm1, %v1245_v21  ;;  %1438 = vst.msk [vmem:[%s2814_s3 + $0x2a8] sm:$0xff] %vm1352_vm1, %v1309_v22  ;;  %v1250_v27 = vmax.f32 %v818_v23, 0.0  ;;  %v1314_v28 = vmax.f32 %v1074_v24, 0.0  ;;  %v810_v29 = vadd.f32 %v2169_v2, %v809_v25  ;;  %v1066_v30 = vadd.f32 %v2169_v2, %v1065_v26 }
  0xfe   :  { %v1713_v31 = vpop.f32.mrf.mxu0  ;;  %v1777_v32 = vpop.f32.mrf.mxu1 }
  0xff   :  { %1379 = vst.msk [vmem:[%s2814_s3 + $0xd0] sm:$0xff] %vm1352_vm1, %v1250_v27  ;;  %1443 = vst.msk [vmem:[%s2814_s3 + $0x2d0] sm:$0xff] %vm1352_vm1, %v1314_v28  ;;  %v1248_v33 = vmax.f32 %v810_v29, 0.0  ;;  %v1312_v34 = vmax.f32 %v1066_v30, 0.0  ;;  %v821_v35 = vadd.f32 %v1713_v31, %v2169_v2  ;;  %v1077_v36 = vadd.f32 %v1777_v32, %v2169_v2 }
 0x100   :  { %v812_v37 = vpop.f32.mrf.mxu0  ;;  %v1068_v38 = vpop.f32.mrf.mxu1 }
 0x101   :  { %1377 = vst.msk [vmem:[%s2814_s3 + $0xc0] sm:$0xff] %vm1352_vm1, %v1248_v33  ;;  %1441 = vst.msk [vmem:[%s2814_s3 + $0x2c0] sm:$0xff] %vm1352_vm1, %v1312_v34  ;;  %v1251_v39 = vmax.f32 %v821_v35, 0.0  ;;  %v1315_v40 = vmax.f32 %v1077_v36, 0.0  ;;  %v813_v41 = vadd.f32 %v2169_v2, %v812_v37  ;;  %v1069_v42 = vadd.f32 %v2169_v2, %v1068_v38 }
 0x102   :  { %v1716_v43 = vpop.f32.mrf.mxu0  ;;  %v1780_v44 = vpop.f32.mrf.mxu1 }
 0x103   :  { %1380 = vst.msk [vmem:[%s2814_s3 + $0xd8] sm:$0xff] %vm1352_vm1, %v1251_v39  ;;  %1444 = vst.msk [vmem:[%s2814_s3 + $0x2d8] sm:$0xff] %vm1352_vm1, %v1315_v40  ;;  %v1249_v45 = vmax.f32 %v813_v41, 0.0  ;;  %v1313_v46 = vmax.f32 %v1069_v42, 0.0  ;;  %v834_v47 = vadd.f32 %v1716_v43, %v2169_v2  ;;  %v1090_v48 = vadd.f32 %v1780_v44, %v2169_v2 }
 0x104   :  { %v825_v49 = vpop.f32.mrf.mxu0  ;;  %v1081_v50 = vpop.f32.mrf.mxu1 }
 0x105   :  { %1378 = vst.msk [vmem:[%s2814_s3 + $0xc8] sm:$0xff] %vm1352_vm1, %v1249_v45  ;;  %1442 = vst.msk [vmem:[%s2814_s3 + $0x2c8] sm:$0xff] %vm1352_vm1, %v1313_v46  ;;  %v1254_v51 = vmax.f32 %v834_v47, 0.0  ;;  %v1318_v52 = vmax.f32 %v1090_v48, 0.0  ;;  %v826_v53 = vadd.f32 %v2169_v2, %v825_v49  ;;  %v1082_v54 = vadd.f32 %v2169_v2, %v1081_v50 }
 0x106   :  { %v1717_v55 = vpop.f32.mrf.mxu0  ;;  %v1781_v56 = vpop.f32.mrf.mxu1 }
 0x107   :  { %1383 = vst.msk [vmem:[%s2814_s3 + $0xf0] sm:$0xff] %vm1352_vm1, %v1254_v51  ;;  %1447 = vst.msk [vmem:[%s2814_s3 + $0x2f0] sm:$0xff] %vm1352_vm1, %v1318_v52  ;;  %v1252_v57 = vmax.f32 %v826_v53, 0.0  ;;  %v1316_v58 = vmax.f32 %v1082_v54, 0.0  ;;  %v837_v59 = vadd.f32 %v1717_v55, %v2169_v2  ;;  %v1093_v60 = vadd.f32 %v1781_v56, %v2169_v2 }
 0x108   :  { %v828_v61 = vpop.f32.mrf.mxu0  ;;  %v1084_v62 = vpop.f32.mrf.mxu1 }
 0x109   :  { %1381 = vst.msk [vmem:[%s2814_s3 + $0xe0] sm:$0xff] %vm1352_vm1, %v1252_v57  ;;  %1445 = vst.msk [vmem:[%s2814_s3 + $0x2e0] sm:$0xff] %vm1352_vm1, %v1316_v58  ;;  %v1255_v63 = vmax.f32 %v837_v59, 0.0  ;;  %v1319_v0 = vmax.f32 %v1093_v60, 0.0  ;;  %v829_v1 = vadd.f32 %v2169_v2, %v828_v61  ;;  %v1085_v3 = vadd.f32 %v2169_v2, %v1084_v62 }
 0x10a   :  { %v1720_v4 = vpop.f32.mrf.mxu0  ;;  %v1784_v5 = vpop.f32.mrf.mxu1 }
 0x10b   :  { %1384 = vst.msk [vmem:[%s2814_s3 + $0xf8] sm:$0xff] %vm1352_vm1, %v1255_v63  ;;  %1448 = vst.msk [vmem:[%s2814_s3 + $0x2f8] sm:$0xff] %vm1352_vm1, %v1319_v0  ;;  %v1253_v6 = vmax.f32 %v829_v1, 0.0  ;;  %v1317_v7 = vmax.f32 %v1085_v3, 0.0  ;;  %v850_v8 = vadd.f32 %v1720_v4, %v2169_v2  ;;  %v1106_v9 = vadd.f32 %v1784_v5, %v2169_v2 }
 0x10c   :  { %v841_v10 = vpop.f32.mrf.mxu0  ;;  %v1097_v11 = vpop.f32.mrf.mxu1 }
 0x10d   :  { %1382 = vst.msk [vmem:[%s2814_s3 + $0xe8] sm:$0xff] %vm1352_vm1, %v1253_v6  ;;  %1446 = vst.msk [vmem:[%s2814_s3 + $0x2e8] sm:$0xff] %vm1352_vm1, %v1317_v7  ;;  %v1258_v12 = vmax.f32 %v850_v8, 0.0  ;;  %v1322_v13 = vmax.f32 %v1106_v9, 0.0  ;;  %v842_v14 = vadd.f32 %v2169_v2, %v841_v10  ;;  %v1098_v15 = vadd.f32 %v2169_v2, %v1097_v11 }
 0x10e   :  { %v1721_v16 = vpop.f32.mrf.mxu0  ;;  %v1785_v17 = vpop.f32.mrf.mxu1 }
 0x10f   :  { %1387 = vst.msk [vmem:[%s2814_s3 + $0x110] sm:$0xff] %vm1352_vm1, %v1258_v12  ;;  %1451 = vst.msk [vmem:[%s2814_s3 + $0x310] sm:$0xff] %vm1352_vm1, %v1322_v13  ;;  %v1256_v18 = vmax.f32 %v842_v14, 0.0  ;;  %v1320_v19 = vmax.f32 %v1098_v15, 0.0  ;;  %v853_v20 = vadd.f32 %v1721_v16, %v2169_v2  ;;  %v1109_v21 = vadd.f32 %v1785_v17, %v2169_v2 }
 0x110   :  { %v844_v22 = vpop.f32.mrf.mxu0  ;;  %v1100_v23 = vpop.f32.mrf.mxu1 }
 0x111   :  { %1385 = vst.msk [vmem:[%s2814_s3 + $0x100] sm:$0xff] %vm1352_vm1, %v1256_v18  ;;  %1449 = vst.msk [vmem:[%s2814_s3 + $0x300] sm:$0xff] %vm1352_vm1, %v1320_v19  ;;  %v1259_v24 = vmax.f32 %v853_v20, 0.0  ;;  %v1323_v25 = vmax.f32 %v1109_v21, 0.0  ;;  %v845_v26 = vadd.f32 %v2169_v2, %v844_v22  ;;  %v1101_v27 = vadd.f32 %v2169_v2, %v1100_v23 }
 0x112   :  { %v1724_v28 = vpop.f32.mrf.mxu0  ;;  %v1788_v29 = vpop.f32.mrf.mxu1 }
 0x113   :  { %1388 = vst.msk [vmem:[%s2814_s3 + $0x118] sm:$0xff] %vm1352_vm1, %v1259_v24  ;;  %1452 = vst.msk [vmem:[%s2814_s3 + $0x318] sm:$0xff] %vm1352_vm1, %v1323_v25  ;;  %v1257_v30 = vmax.f32 %v845_v26, 0.0  ;;  %v1321_v31 = vmax.f32 %v1101_v27, 0.0  ;;  %v866_v32 = vadd.f32 %v1724_v28, %v2169_v2  ;;  %v1122_v33 = vadd.f32 %v1788_v29, %v2169_v2 }
 0x114   :  { %v857_v34 = vpop.f32.mrf.mxu0  ;;  %v1113_v35 = vpop.f32.mrf.mxu1 }
 0x115   :  { %1386 = vst.msk [vmem:[%s2814_s3 + $0x108] sm:$0xff] %vm1352_vm1, %v1257_v30  ;;  %1450 = vst.msk [vmem:[%s2814_s3 + $0x308] sm:$0xff] %vm1352_vm1, %v1321_v31  ;;  %v1262_v36 = vmax.f32 %v866_v32, 0.0  ;;  %v1326_v37 = vmax.f32 %v1122_v33, 0.0  ;;  %v858_v38 = vadd.f32 %v2169_v2, %v857_v34  ;;  %v1114_v39 = vadd.f32 %v2169_v2, %v1113_v35 }
 0x116   :  { %v1725_v40 = vpop.f32.mrf.mxu0  ;;  %v1789_v41 = vpop.f32.mrf.mxu1 }
 0x117   :  { %1391 = vst.msk [vmem:[%s2814_s3 + $0x130] sm:$0xff] %vm1352_vm1, %v1262_v36  ;;  %1455 = vst.msk [vmem:[%s2814_s3 + $0x330] sm:$0xff] %vm1352_vm1, %v1326_v37  ;;  %v1260_v42 = vmax.f32 %v858_v38, 0.0  ;;  %v1324_v43 = vmax.f32 %v1114_v39, 0.0  ;;  %v869_v44 = vadd.f32 %v1725_v40, %v2169_v2  ;;  %v1125_v45 = vadd.f32 %v1789_v41, %v2169_v2 }
 0x118   :  { %v860_v46 = vpop.f32.mrf.mxu0  ;;  %v1116_v47 = vpop.f32.mrf.mxu1 }
 0x119   :  { %1389 = vst.msk [vmem:[%s2814_s3 + $0x120] sm:$0xff] %vm1352_vm1, %v1260_v42  ;;  %1453 = vst.msk [vmem:[%s2814_s3 + $0x320] sm:$0xff] %vm1352_vm1, %v1324_v43  ;;  %v1263_v48 = vmax.f32 %v869_v44, 0.0  ;;  %v1327_v49 = vmax.f32 %v1125_v45, 0.0  ;;  %v861_v50 = vadd.f32 %v2169_v2, %v860_v46  ;;  %v1117_v51 = vadd.f32 %v2169_v2, %v1116_v47 }
 0x11a   :  { %v1728_v52 = vpop.f32.mrf.mxu0  ;;  %v1792_v53 = vpop.f32.mrf.mxu1 }
 0x11b   :  { %1392 = vst.msk [vmem:[%s2814_s3 + $0x138] sm:$0xff] %vm1352_vm1, %v1263_v48  ;;  %1456 = vst.msk [vmem:[%s2814_s3 + $0x338] sm:$0xff] %vm1352_vm1, %v1327_v49  ;;  %v1261_v54 = vmax.f32 %v861_v50, 0.0  ;;  %v1325_v55 = vmax.f32 %v1117_v51, 0.0  ;;  %v882_v56 = vadd.f32 %v1728_v52, %v2169_v2  ;;  %v1138_v57 = vadd.f32 %v1792_v53, %v2169_v2 }
 0x11c   :  { %v873_v58 = vpop.f32.mrf.mxu0  ;;  %v1129_v59 = vpop.f32.mrf.mxu1 }
 0x11d   :  { %1390 = vst.msk [vmem:[%s2814_s3 + $0x128] sm:$0xff] %vm1352_vm1, %v1261_v54  ;;  %1454 = vst.msk [vmem:[%s2814_s3 + $0x328] sm:$0xff] %vm1352_vm1, %v1325_v55  ;;  %v1266_v60 = vmax.f32 %v882_v56, 0.0  ;;  %v1330_v61 = vmax.f32 %v1138_v57, 0.0  ;;  %v874_v62 = vadd.f32 %v2169_v2, %v873_v58  ;;  %v1130_v63 = vadd.f32 %v2169_v2, %v1129_v59 }
 0x11e   :  { %v1729_v0 = vpop.f32.mrf.mxu0  ;;  %v1793_v1 = vpop.f32.mrf.mxu1 }
 0x11f   :  { %1395 = vst.msk [vmem:[%s2814_s3 + $0x150] sm:$0xff] %vm1352_vm1, %v1266_v60  ;;  %1459 = vst.msk [vmem:[%s2814_s3 + $0x350] sm:$0xff] %vm1352_vm1, %v1330_v61  ;;  %v1264_v3 = vmax.f32 %v874_v62, 0.0  ;;  %v1328_v4 = vmax.f32 %v1130_v63, 0.0  ;;  %v885_v5 = vadd.f32 %v1729_v0, %v2169_v2  ;;  %v1141_v6 = vadd.f32 %v1793_v1, %v2169_v2 }
 0x120   :  { %v876_v7 = vpop.f32.mrf.mxu0  ;;  %v1132_v8 = vpop.f32.mrf.mxu1 }
 0x121   :  { %1393 = vst.msk [vmem:[%s2814_s3 + $0x140] sm:$0xff] %vm1352_vm1, %v1264_v3  ;;  %1457 = vst.msk [vmem:[%s2814_s3 + $0x340] sm:$0xff] %vm1352_vm1, %v1328_v4  ;;  %v1267_v9 = vmax.f32 %v885_v5, 0.0  ;;  %v1331_v10 = vmax.f32 %v1141_v6, 0.0  ;;  %v877_v11 = vadd.f32 %v2169_v2, %v876_v7  ;;  %v1133_v12 = vadd.f32 %v2169_v2, %v1132_v8 }
 0x122   :  { %v1732_v13 = vpop.f32.mrf.mxu0  ;;  %v1796_v14 = vpop.f32.mrf.mxu1 }
 0x123   :  { %1396 = vst.msk [vmem:[%s2814_s3 + $0x158] sm:$0xff] %vm1352_vm1, %v1267_v9  ;;  %1460 = vst.msk [vmem:[%s2814_s3 + $0x358] sm:$0xff] %vm1352_vm1, %v1331_v10  ;;  %v1265_v15 = vmax.f32 %v877_v11, 0.0  ;;  %v1329_v16 = vmax.f32 %v1133_v12, 0.0  ;;  %v898_v17 = vadd.f32 %v1732_v13, %v2169_v2  ;;  %v1154_v18 = vadd.f32 %v1796_v14, %v2169_v2 }
 0x124   :  { %v889_v19 = vpop.f32.mrf.mxu0  ;;  %v1145_v20 = vpop.f32.mrf.mxu1 }
 0x125   :  { %1394 = vst.msk [vmem:[%s2814_s3 + $0x148] sm:$0xff] %vm1352_vm1, %v1265_v15  ;;  %1458 = vst.msk [vmem:[%s2814_s3 + $0x348] sm:$0xff] %vm1352_vm1, %v1329_v16  ;;  %v1270_v21 = vmax.f32 %v898_v17, 0.0  ;;  %v1334_v22 = vmax.f32 %v1154_v18, 0.0  ;;  %v890_v23 = vadd.f32 %v2169_v2, %v889_v19  ;;  %v1146_v24 = vadd.f32 %v2169_v2, %v1145_v20 }
 0x126   :  { %v1733_v25 = vpop.f32.mrf.mxu0  ;;  %v1797_v26 = vpop.f32.mrf.mxu1 }
 0x127   :  { %1399 = vst.msk [vmem:[%s2814_s3 + $0x170] sm:$0xff] %vm1352_vm1, %v1270_v21  ;;  %1463 = vst.msk [vmem:[%s2814_s3 + $0x370] sm:$0xff] %vm1352_vm1, %v1334_v22  ;;  %v1268_v27 = vmax.f32 %v890_v23, 0.0  ;;  %v1332_v28 = vmax.f32 %v1146_v24, 0.0  ;;  %v901_v29 = vadd.f32 %v1733_v25, %v2169_v2  ;;  %v1157_v30 = vadd.f32 %v1797_v26, %v2169_v2 }
 0x128   :  { %v892_v31 = vpop.f32.mrf.mxu0  ;;  %v1148_v32 = vpop.f32.mrf.mxu1 }
 0x129   :  { %1397 = vst.msk [vmem:[%s2814_s3 + $0x160] sm:$0xff] %vm1352_vm1, %v1268_v27  ;;  %1461 = vst.msk [vmem:[%s2814_s3 + $0x360] sm:$0xff] %vm1352_vm1, %v1332_v28  ;;  %v1271_v33 = vmax.f32 %v901_v29, 0.0  ;;  %v1335_v34 = vmax.f32 %v1157_v30, 0.0  ;;  %v893_v35 = vadd.f32 %v2169_v2, %v892_v31  ;;  %v1149_v36 = vadd.f32 %v2169_v2, %v1148_v32 }
 0x12a   :  { %v1736_v37 = vpop.f32.mrf.mxu0  ;;  %v1800_v38 = vpop.f32.mrf.mxu1 }
 0x12b   :  { %1400 = vst.msk [vmem:[%s2814_s3 + $0x178] sm:$0xff] %vm1352_vm1, %v1271_v33  ;;  %1464 = vst.msk [vmem:[%s2814_s3 + $0x378] sm:$0xff] %vm1352_vm1, %v1335_v34  ;;  %v1269_v39 = vmax.f32 %v893_v35, 0.0  ;;  %v1333_v40 = vmax.f32 %v1149_v36, 0.0  ;;  %v914_v41 = vadd.f32 %v1736_v37, %v2169_v2  ;;  %v1170_v42 = vadd.f32 %v1800_v38, %v2169_v2 }
 0x12c   :  { %v905_v43 = vpop.f32.mrf.mxu0  ;;  %v1161_v44 = vpop.f32.mrf.mxu1 }
 0x12d   :  { %1398 = vst.msk [vmem:[%s2814_s3 + $0x168] sm:$0xff] %vm1352_vm1, %v1269_v39  ;;  %1462 = vst.msk [vmem:[%s2814_s3 + $0x368] sm:$0xff] %vm1352_vm1, %v1333_v40  ;;  %v1274_v45 = vmax.f32 %v914_v41, 0.0  ;;  %v1338_v46 = vmax.f32 %v1170_v42, 0.0  ;;  %v906_v47 = vadd.f32 %v2169_v2, %v905_v43  ;;  %v1162_v48 = vadd.f32 %v2169_v2, %v1161_v44 }
 0x12e   :  { %v1737_v49 = vpop.f32.mrf.mxu0  ;;  %v1801_v50 = vpop.f32.mrf.mxu1 }
 0x12f   :  { %1403 = vst.msk [vmem:[%s2814_s3 + $0x190] sm:$0xff] %vm1352_vm1, %v1274_v45  ;;  %1467 = vst.msk [vmem:[%s2814_s3 + $0x390] sm:$0xff] %vm1352_vm1, %v1338_v46  ;;  %v1272_v51 = vmax.f32 %v906_v47, 0.0  ;;  %v1336_v52 = vmax.f32 %v1162_v48, 0.0  ;;  %v917_v53 = vadd.f32 %v1737_v49, %v2169_v2  ;;  %v1173_v54 = vadd.f32 %v1801_v50, %v2169_v2 }
 0x130   :  { %v908_v55 = vpop.f32.mrf.mxu0  ;;  %v1164_v56 = vpop.f32.mrf.mxu1 }
 0x131   :  { %1401 = vst.msk [vmem:[%s2814_s3 + $0x180] sm:$0xff] %vm1352_vm1, %v1272_v51  ;;  %1465 = vst.msk [vmem:[%s2814_s3 + $0x380] sm:$0xff] %vm1352_vm1, %v1336_v52  ;;  %v1275_v57 = vmax.f32 %v917_v53, 0.0  ;;  %v1339_v58 = vmax.f32 %v1173_v54, 0.0  ;;  %v909_v59 = vadd.f32 %v2169_v2, %v908_v55  ;;  %v1165_v60 = vadd.f32 %v2169_v2, %v1164_v56 }
 0x132   :  { %v1740_v61 = vpop.f32.mrf.mxu0  ;;  %v1804_v62 = vpop.f32.mrf.mxu1 }
 0x133   :  { %1404 = vst.msk [vmem:[%s2814_s3 + $0x198] sm:$0xff] %vm1352_vm1, %v1275_v57  ;;  %1468 = vst.msk [vmem:[%s2814_s3 + $0x398] sm:$0xff] %vm1352_vm1, %v1339_v58  ;;  %v1273_v63 = vmax.f32 %v909_v59, 0.0  ;;  %v1337_v0 = vmax.f32 %v1165_v60, 0.0  ;;  %v930_v1 = vadd.f32 %v1740_v61, %v2169_v2  ;;  %v1186_v3 = vadd.f32 %v1804_v62, %v2169_v2 }
 0x134   :  { %v921_v4 = vpop.f32.mrf.mxu0  ;;  %v1177_v5 = vpop.f32.mrf.mxu1 }
 0x135   :  { %1402 = vst.msk [vmem:[%s2814_s3 + $0x188] sm:$0xff] %vm1352_vm1, %v1273_v63  ;;  %1466 = vst.msk [vmem:[%s2814_s3 + $0x388] sm:$0xff] %vm1352_vm1, %v1337_v0  ;;  %v1278_v6 = vmax.f32 %v930_v1, 0.0  ;;  %v1342_v7 = vmax.f32 %v1186_v3, 0.0  ;;  %v922_v8 = vadd.f32 %v2169_v2, %v921_v4  ;;  %v1178_v9 = vadd.f32 %v2169_v2, %v1177_v5 }
 0x136   :  { %v1741_v10 = vpop.f32.mrf.mxu0  ;;  %v1805_v11 = vpop.f32.mrf.mxu1 }
 0x137   :  { %1407 = vst.msk [vmem:[%s2814_s3 + $0x1b0] sm:$0xff] %vm1352_vm1, %v1278_v6  ;;  %1471 = vst.msk [vmem:[%s2814_s3 + $0x3b0] sm:$0xff] %vm1352_vm1, %v1342_v7  ;;  %v1276_v12 = vmax.f32 %v922_v8, 0.0  ;;  %v1340_v13 = vmax.f32 %v1178_v9, 0.0  ;;  %v933_v14 = vadd.f32 %v1741_v10, %v2169_v2  ;;  %v1189_v15 = vadd.f32 %v1805_v11, %v2169_v2 }
 0x138   :  { %v924_v16 = vpop.f32.mrf.mxu0  ;;  %v1180_v17 = vpop.f32.mrf.mxu1 }
 0x139   :  { %1405 = vst.msk [vmem:[%s2814_s3 + $0x1a0] sm:$0xff] %vm1352_vm1, %v1276_v12  ;;  %1469 = vst.msk [vmem:[%s2814_s3 + $0x3a0] sm:$0xff] %vm1352_vm1, %v1340_v13  ;;  %v1279_v18 = vmax.f32 %v933_v14, 0.0  ;;  %v1343_v19 = vmax.f32 %v1189_v15, 0.0  ;;  %v925_v20 = vadd.f32 %v2169_v2, %v924_v16  ;;  %v1181_v21 = vadd.f32 %v2169_v2, %v1180_v17 }
 0x13a   :  { %v1744_v22 = vpop.f32.mrf.mxu0  ;;  %v1808_v23 = vpop.f32.mrf.mxu1 }
 0x13b   :  { %1408 = vst.msk [vmem:[%s2814_s3 + $0x1b8] sm:$0xff] %vm1352_vm1, %v1279_v18  ;;  %1472 = vst.msk [vmem:[%s2814_s3 + $0x3b8] sm:$0xff] %vm1352_vm1, %v1343_v19  ;;  %v1277_v24 = vmax.f32 %v925_v20, 0.0  ;;  %v1341_v25 = vmax.f32 %v1181_v21, 0.0  ;;  %v946_v26 = vadd.f32 %v1744_v22, %v2169_v2  ;;  %v1202_v27 = vadd.f32 %v1808_v23, %v2169_v2 }
 0x13c   :  { %v937_v28 = vpop.f32.mrf.mxu0  ;;  %v1193_v29 = vpop.f32.mrf.mxu1 }
 0x13d   :  { %1406 = vst.msk [vmem:[%s2814_s3 + $0x1a8] sm:$0xff] %vm1352_vm1, %v1277_v24  ;;  %1470 = vst.msk [vmem:[%s2814_s3 + $0x3a8] sm:$0xff] %vm1352_vm1, %v1341_v25  ;;  %v1282_v30 = vmax.f32 %v946_v26, 0.0  ;;  %v1346_v31 = vmax.f32 %v1202_v27, 0.0  ;;  %v938_v32 = vadd.f32 %v2169_v2, %v937_v28  ;;  %v1194_v33 = vadd.f32 %v2169_v2, %v1193_v29 }
 0x13e   :  { %v1745_v34 = vpop.f32.mrf.mxu0  ;;  %v1809_v35 = vpop.f32.mrf.mxu1 }
 0x13f   :  { %1411 = vst.msk [vmem:[%s2814_s3 + $0x1d0] sm:$0xff] %vm1352_vm1, %v1282_v30  ;;  %1475 = vst.msk [vmem:[%s2814_s3 + $0x3d0] sm:$0xff] %vm1352_vm1, %v1346_v31  ;;  %v1280_v36 = vmax.f32 %v938_v32, 0.0  ;;  %v1344_v37 = vmax.f32 %v1194_v33, 0.0  ;;  %v949_v38 = vadd.f32 %v1745_v34, %v2169_v2  ;;  %v1205_v39 = vadd.f32 %v1809_v35, %v2169_v2 }
 0x140   :  { %v940_v40 = vpop.f32.mrf.mxu0  ;;  %v1196_v41 = vpop.f32.mrf.mxu1 }
 0x141   :  { %1409 = vst.msk [vmem:[%s2814_s3 + $0x1c0] sm:$0xff] %vm1352_vm1, %v1280_v36  ;;  %1473 = vst.msk [vmem:[%s2814_s3 + $0x3c0] sm:$0xff] %vm1352_vm1, %v1344_v37  ;;  %v1283_v42 = vmax.f32 %v949_v38, 0.0  ;;  %v1347_v43 = vmax.f32 %v1205_v39, 0.0  ;;  %v941_v44 = vadd.f32 %v2169_v2, %v940_v40  ;;  %v1197_v45 = vadd.f32 %v2169_v2, %v1196_v41 }
 0x142   :  { %v1748_v46 = vpop.f32.mrf.mxu0  ;;  %v1812_v47 = vpop.f32.mrf.mxu1 }
 0x143   :  { %1412 = vst.msk [vmem:[%s2814_s3 + $0x1d8] sm:$0xff] %vm1352_vm1, %v1283_v42  ;;  %1476 = vst.msk [vmem:[%s2814_s3 + $0x3d8] sm:$0xff] %vm1352_vm1, %v1347_v43  ;;  %v1281_v48 = vmax.f32 %v941_v44, 0.0  ;;  %v1345_v49 = vmax.f32 %v1197_v45, 0.0  ;;  %v962_v50 = vadd.f32 %v1748_v46, %v2169_v2  ;;  %v1218_v51 = vadd.f32 %v1812_v47, %v2169_v2 }
 0x144   :  { %v953_v52 = vpop.f32.mrf.mxu0  ;;  %v1209_v53 = vpop.f32.mrf.mxu1 }
 0x145   :  { %1410 = vst.msk [vmem:[%s2814_s3 + $0x1c8] sm:$0xff] %vm1352_vm1, %v1281_v48  ;;  %1474 = vst.msk [vmem:[%s2814_s3 + $0x3c8] sm:$0xff] %vm1352_vm1, %v1345_v49  ;;  %v1286_v54 = vmax.f32 %v962_v50, 0.0  ;;  %v1350_v55 = vmax.f32 %v1218_v51, 0.0  ;;  %v954_v56 = vadd.f32 %v2169_v2, %v953_v52  ;;  %v1210_v57 = vadd.f32 %v2169_v2, %v1209_v53 }
 0x146   :  { %v1749_v58 = vpop.f32.mrf.mxu0  ;;  %v1813_v59 = vpop.f32.mrf.mxu1 }
 0x147   :  { %1415 = vst.msk [vmem:[%s2814_s3 + $0x1f0] sm:$0xff] %vm1352_vm1, %v1286_v54  ;;  %1479 = vst.msk [vmem:[%s2814_s3 + $0x3f0] sm:$0xff] %vm1352_vm1, %v1350_v55  ;;  %v1284_v60 = vmax.f32 %v954_v56, 0.0  ;;  %v1348_v61 = vmax.f32 %v1210_v57, 0.0  ;;  %v965_v62 = vadd.f32 %v1749_v58, %v2169_v2  ;;  %v1221_v63 = vadd.f32 %v1813_v59, %v2169_v2 }
 0x148   :  { %v956_v0 = vpop.f32.mrf.mxu0  ;;  %v1212_v1 = vpop.f32.mrf.mxu1 }
 0x149   :  { %1413 = vst.msk [vmem:[%s2814_s3 + $0x1e0] sm:$0xff] %vm1352_vm1, %v1284_v60  ;;  %1477 = vst.msk [vmem:[%s2814_s3 + $0x3e0] sm:$0xff] %vm1352_vm1, %v1348_v61  ;;  %v1287_v3 = vmax.f32 %v965_v62, 0.0  ;;  %v1351_v4 = vmax.f32 %v1221_v63, 0.0  ;;  %v957_v5 = vadd.f32 %v2169_v2, %v956_v0  ;;  %v1213_v6 = vadd.f32 %v2169_v2, %v1212_v1 }
 0x14b   :  { %1416 = vst.msk [vmem:[%s2814_s3 + $0x1f8] sm:$0xff] %vm1352_vm1, %v1287_v3  ;;  %1480 = vst.msk [vmem:[%s2814_s3 + $0x3f8] sm:$0xff] %vm1352_vm1, %v1351_v4  ;;  %v1285_v7 = vmax.f32 %v957_v5, 0.0  ;;  %v1349_v8 = vmax.f32 %v1213_v6, 0.0 }
 0x14d   :  { %1414 = vst.msk [vmem:[%s2814_s3 + $0x1e8] sm:$0xff] %vm1352_vm1, %v1285_v7  ;;  %1478 = vst.msk [vmem:[%s2814_s3 + $0x3e8] sm:$0xff] %vm1352_vm1, %v1349_v8 }

</bundles_post_ra>
